<compile_context>
chip_gen: v7x
topology: tpu7x:2x2x1
jax: 0.10.0
libtpu: 0.0.40
codegen_flags: <defaults>
</compile_context>

<pallas_src>
import functools

import jax
import jax.numpy as jnp
from jax.experimental import pallas as pl
from jax.experimental.pallas import tpu as pltpu


# --------------------------------------------------------------------------- #
# Kernel
# --------------------------------------------------------------------------- #
def actor_kernel(s_ref, w1_ref, w2_ref, b2_ref, o_ref):
    """One batch tile: VPU layer-1 (K tiny) + MXU layer-2 + tanh."""
    s = s_ref[...]                       # [block_b, S]
    w1 = w1_ref[...]                     # [S+1, H]   (last row = bias b1)
    S = s.shape[1]

    # Layer 1 on the VPU: h = sum_k s[:, k] (outer) w1[k, :]  + b1, then relu.
    # With S == 2 this is 2 vmul + 2 vadd on [block_b, H] vregs — no MXU
    # padding/relayout for a K=2 contraction.
    h = s[:, 0:1] * w1[0:1, :]
    for k in range(1, S):                # static Python loop (S is tiny)
        h = h + s[:, k:k + 1] * w1[k:k + 1, :]
    h = h + w1[S:S + 1, :]               # folded bias row, broadcast over rows
    h = jnp.maximum(h, 0.0)

    # Layer 2 on the MXU: K = hidden = 128 matches the contraction width.
    a = jnp.dot(h, w2_ref[...], preferred_element_type=jnp.float32)
    a = a + b2_ref[...]                  # [block_b, A_pad] + [1, A_pad]
    o_ref[...] = jnp.tanh(a)


# --------------------------------------------------------------------------- #
# One-time parameter packing (hoisted out of the per-call hot path)
# --------------------------------------------------------------------------- #
def pack_actor_params(w1_t, b1, w2_t, b2, *, lane_pad=128):
    """Fold b1 into W1 and lane-pad W2/b2.  Run ONCE per set of weights."""
    S, H = w1_t.shape
    _, A = w2_t.shape
    w1_aug = jnp.concatenate([w1_t, b1.reshape(1, H)], axis=0)       # [S+1, H]
    A_pad = pl.cdiv(A, lane_pad) * lane_pad
    w2_pad = jnp.pad(w2_t, ((0, 0), (0, A_pad - A)))                 # [H, A_pad]
    b2_pad = jnp.pad(b2.reshape(1, A), ((0, 0), (0, A_pad - A)))     # [1, A_pad]
    return w1_aug, w2_pad, b2_pad


def _round_up(x, m):
    return ((x + m - 1) // m) * m


def choose_block_b(batch, cap=2048):
    """One fat tile (grid collapses to a single step) for small/medium B;
    tile by `cap` rows only when the batch is genuinely large."""
    if batch <= cap:
        return max(_round_up(batch, 8), 8)
    return cap


# --------------------------------------------------------------------------- #
# Jitted forward on pre-packed params.  Returns the PADDED (B_pad, A_pad)
# buffer; slicing to (B, A) is left to the consumer (done once, lazily).
# --------------------------------------------------------------------------- #
@functools.partial(jax.jit, static_argnames=("block_b",))
def actor_forward_padded(state, w1_aug, w2_pad, b2_pad, *, block_b):
    B, S = state.shape
    Sp1, H = w1_aug.shape
    assert Sp1 == S + 1
    _, A_pad = w2_pad.shape

    B_pad = _round_up(B, block_b)
    state_p = jnp.pad(state, ((0, B_pad - B), (0, 0))) if B_pad != B else state

    grid_steps = B_pad // block_b
    # Split across v7x's two TensorCores only when each gets real work;
    # a single fat tile runs on one TC with no coordination overhead.
    semantics = ("parallel",) if grid_steps > 1 else ("arbitrary",)

    out = pl.pallas_call(
        actor_kernel,
        out_shape=jax.ShapeDtypeStruct((B_pad, A_pad), jnp.float32),
        grid=(grid_steps,),
        in_specs=[
            pl.BlockSpec((block_b, S), lambda i: (i, 0)),   # state tile
            pl.BlockSpec((S + 1, H), lambda i: (0, 0)),     # W1+b1 (VMEM-resident)
            pl.BlockSpec((H, A_pad), lambda i: (0, 0)),     # W2     (VMEM-resident)
            pl.BlockSpec((1, A_pad), lambda i: (0, 0)),     # b2     (VMEM-resident)
        ],
        out_specs=pl.BlockSpec((block_b, A_pad), lambda i: (i, 0)),
        compiler_params=pltpu.CompilerParams(dimension_semantics=semantics),
    )(state_p, w1_aug, w2_pad, b2_pad)

    return out


# --------------------------------------------------------------------------- #
# Thin module-like wrapper (packs once, slices once at the consumer side)
# --------------------------------------------------------------------------- #
class ActorNetworkPallas:
    def __init__(self, w1_t, b1, w2_t, b2):
        self.action_dim = w2_t.shape[1]
        self.w1_aug, self.w2_pad, self.b2_pad = pack_actor_params(w1_t, b1, w2_t, b2)

    def __call__(self, state):
        B = state.shape[0]
        block_b = choose_block_b(B)
        out_padded = actor_forward_padded(
            state, self.w1_aug, self.w2_pad, self.b2_pad, block_b=block_b)
        return out_padded[:B, :self.action_dim]


def init_params(key, state_dim, action_dim, hidden_dim):
    """PyTorch nn.Linear default init: U(-1/sqrt(fan_in), +1/sqrt(fan_in))."""
    k1, k2, k3, k4 = jax.random.split(key, 4)
    bound1 = 1.0 / jnp.sqrt(state_dim)
    bound2 = 1.0 / jnp.sqrt(hidden_dim)
    # Stored already transposed relative to PyTorch: [in, out]
    w1_t = jax.random.uniform(k1, (state_dim, hidden_dim), jnp.float32, -bound1, bound1)
    b1 = jax.random.uniform(k2, (1, hidden_dim), jnp.float32, -bound1, bound1)
    w2_t = jax.random.uniform(k3, (hidden_dim, action_dim), jnp.float32, -bound2, bound2)
    b2 = jax.random.uniform(k4, (1, action_dim), jnp.float32, -bound2, bound2)
    return w1_t, b1, w2_t, b2


if __name__ == "__main__":
    # MountainCar-ish sizes: state_dim=2, action_dim=3, hidden=128, batch=256.
    B, STATE_DIM, ACTION_DIM, HIDDEN = 256, 2, 3, 128

    key = jax.random.PRNGKey(0)
    kx, kp = jax.random.split(key)
    state = jax.random.normal(kx, (B, STATE_DIM), jnp.float32)
    w1_t, b1, w2_t, b2 = init_params(kp, STATE_DIM, ACTION_DIM, HIDDEN)

    # One-time packing outside the hot path.
    w1_aug, w2_pad, b2_pad = pack_actor_params(w1_t, b1, w2_t, b2)
    w1_aug, w2_pad, b2_pad = jax.block_until_ready((w1_aug, w2_pad, b2_pad))

    # Hot path: single pallas_call, one fat batch tile (grid of 1 step).
    block_b = choose_block_b(B)
    out_padded = actor_forward_padded(state, w1_aug, w2_pad, b2_pad, block_b=block_b)
    out_padded = jax.block_until_ready(out_padded)

    # Consumer-side (lazy) slice back to the logical shape.
    out = out_padded[:B, :ACTION_DIM]
    out = jax.block_until_ready(out)

    # Pure-JAX reference check (same math as the PyTorch forward).
    ref = jnp.tanh(jnp.maximum(state @ w1_t + b1, 0.0) @ w2_t + b2)
    assert out.shape == (B, ACTION_DIM)
    assert jnp.allclose(out, ref, atol=1e-5), "mismatch vs reference"

    # Also exercise the module-like wrapper once.
    net = ActorNetworkPallas(w1_t, b1, w2_t, b2)
    out2 = jax.block_until_ready(net(state))
    assert jnp.allclose(out2, ref, atol=1e-5), "wrapper mismatch vs reference"

    print("KERNEL_OK")
</pallas_src>

<mosaic_0001>
module attributes {stable_mosaic.version = 11 : i64} {
  func.func @actor_kernel(%arg0: i32, %arg1: memref<256x2xf32, #tpu.memory_space<vmem>>, %arg2: memref<3x128xf32, #tpu.memory_space<vmem>>, %arg3: memref<128x128xf32, #tpu.memory_space<vmem>>, %arg4: memref<1x128xf32, #tpu.memory_space<vmem>>, %arg5: memref<256x128xf32, #tpu.memory_space<vmem>>) attributes {dimension_semantics = [#tpu.dimension_semantics<arbitrary>], iteration_bounds = array<i64: 1>, scalar_prefetch = 0 : i64, scratch_operands = 0 : i64, tpu.core_type = #tpu.core_type<tc>, window_params = [{transform_indices = @transform_0, window_bounds = array<i64: 256, 2>}, {pipeline_mode = #tpu.pipeline_mode<synchronous>, transform_indices = @transform_1, window_bounds = array<i64: 3, 128>}, {pipeline_mode = #tpu.pipeline_mode<synchronous>, transform_indices = @transform_2, window_bounds = array<i64: 128, 128>}, {pipeline_mode = #tpu.pipeline_mode<synchronous>, transform_indices = @transform_3, window_bounds = array<i64: 1, 128>}, {transform_indices = @transform_4, window_bounds = array<i64: 256, 128>}]} {
    %c0 = arith.constant 0 : index
    %c0_0 = arith.constant 0 : index
    %0 = vector.load %arg1[%c0, %c0_0] : memref<256x2xf32, #tpu.memory_space<vmem>>, vector<256x2xf32>
    %c0_1 = arith.constant 0 : index
    %c0_2 = arith.constant 0 : index
    %1 = vector.load %arg2[%c0_1, %c0_2] : memref<3x128xf32, #tpu.memory_space<vmem>>, vector<3x128xf32>
    %2 = vector.extract_strided_slice %0 {offsets = [0, 0], sizes = [256, 1], strides = [1, 1]} : vector<256x2xf32> to vector<256x1xf32>
    %3 = vector.extract_strided_slice %1 {offsets = [0, 0], sizes = [1, 128], strides = [1, 1]} : vector<3x128xf32> to vector<1x128xf32>
    %4 = vector.broadcast %2 : vector<256x1xf32> to vector<256x128xf32>
    %5 = vector.broadcast %3 : vector<1x128xf32> to vector<256x128xf32>
    %6 = arith.mulf %4, %5 : vector<256x128xf32>
    %7 = vector.extract_strided_slice %0 {offsets = [0, 1], sizes = [256, 1], strides = [1, 1]} : vector<256x2xf32> to vector<256x1xf32>
    %8 = vector.extract_strided_slice %1 {offsets = [1, 0], sizes = [1, 128], strides = [1, 1]} : vector<3x128xf32> to vector<1x128xf32>
    %9 = vector.broadcast %7 : vector<256x1xf32> to vector<256x128xf32>
    %10 = vector.broadcast %8 : vector<1x128xf32> to vector<256x128xf32>
    %11 = arith.mulf %9, %10 : vector<256x128xf32>
    %12 = arith.addf %6, %11 : vector<256x128xf32>
    %13 = vector.extract_strided_slice %1 {offsets = [2, 0], sizes = [1, 128], strides = [1, 1]} : vector<3x128xf32> to vector<1x128xf32>
    %14 = vector.broadcast %13 : vector<1x128xf32> to vector<256x128xf32>
    %15 = arith.addf %12, %14 : vector<256x128xf32>
    %cst = arith.constant 0.000000e+00 : f32
    %16 = vector.broadcast %cst : f32 to vector<256x128xf32>
    %17 = arith.maximumf %15, %16 : vector<256x128xf32>
    %c0_3 = arith.constant 0 : index
    %c0_4 = arith.constant 0 : index
    %18 = vector.load %arg3[%c0_3, %c0_4] : memref<128x128xf32, #tpu.memory_space<vmem>>, vector<128x128xf32>
    %cst_5 = arith.constant dense<0.000000e+00> : vector<256x128xf32>
    %19 = tpu.matmul %17, %18, %cst_5 {dimension_numbers = #tpu.dot_dimension_numbers<[1], [0], [0], [1], [0, 0, 1, 1], [], []>} : vector<256x128xf32>, vector<128x128xf32>, vector<256x128xf32> -> vector<256x128xf32>
    %c0_6 = arith.constant 0 : index
    %c0_7 = arith.constant 0 : index
    %20 = vector.load %arg4[%c0_6, %c0_7] : memref<1x128xf32, #tpu.memory_space<vmem>>, vector<1x128xf32>
    %21 = vector.broadcast %20 : vector<1x128xf32> to vector<256x128xf32>
    %22 = arith.addf %19, %21 : vector<256x128xf32>
    %23 = math.tanh %22 : vector<256x128xf32>
    %c0_8 = arith.constant 0 : index
    %c0_9 = arith.constant 0 : index
    %24 = vector.load %arg5[%c0_8, %c0_9] : memref<256x128xf32, #tpu.memory_space<vmem>>, vector<256x128xf32>
    tpu.vector_store %arg5[%c0_8, %c0_9], %23 {strides = array<i32>} : memref<256x128xf32, #tpu.memory_space<vmem>>, vector<256x128xf32>,
    return
  }
  func.func @transform_0(%arg0: i32) -> (i32, i32) {
    %c0_i32 = arith.constant 0 : i32
    %c0_i32_0 = arith.constant 0 : i32
    return %arg0, %c0_i32 : i32, i32
  }
  func.func @transform_1(%arg0: i32) -> (i32, i32) {
    %c0_i32 = arith.constant 0 : i32
    %c0_i32_0 = arith.constant 0 : i32
    %c0_i32_1 = arith.constant 0 : i32
    return %c0_i32, %c0_i32_0 : i32, i32
  }
  func.func @transform_2(%arg0: i32) -> (i32, i32) {
    %c0_i32 = arith.constant 0 : i32
    %c0_i32_0 = arith.constant 0 : i32
    %c0_i32_1 = arith.constant 0 : i32
    return %c0_i32, %c0_i32_0 : i32, i32
  }
  func.func @transform_3(%arg0: i32) -> (i32, i32) {
    %c0_i32 = arith.constant 0 : i32
    %c0_i32_0 = arith.constant 0 : i32
    %c0_i32_1 = arith.constant 0 : i32
    return %c0_i32, %c0_i32_0 : i32, i32
  }
  func.func @transform_4(%arg0: i32) -> (i32, i32) {
    %c0_i32 = arith.constant 0 : i32
    %c0_i32_0 = arith.constant 0 : i32
    return %arg0, %c0_i32 : i32, i32
  }
}

</mosaic_0001>

<bundles_post_ra>
// kernel: actor_forward_padded.1
= control target key start
LH: loop header
LB: loop body
LE: loop exit
PB: predicated region body
PF: predicated region fallthrough
CT: control target
= control target key end

     0   :  { %v1142_v1 = vmov 1   ;;  %v1143_v2 = vmov 0   ;;  %s1581_s0 = inlined_call_operand.vmem [shape: f32[256,2], index: 0, kind: input, shape index: {}]   ;;  %s1582_s1 = inlined_call_operand.vmem [shape: f32[3,128], index: 1, kind: input, shape index: {}]   ;;  %s1583_s2 = inlined_call_operand.vmem [shape: f32[128,128], index: 2, kind: input, shape index: {}]   ;;  %s1584_s3 = inlined_call_operand.vmem [shape: f32[1,128], index: 3, kind: input, shape index: {}]   ;;  %s1585_s4 = inlined_call_operand.hbm [shape: f32[256,128], index: 4, kind: output, shape index: {}]  }
   0x1   :  { %v18_v0 = vld [vmem:[%s1581_s0] sm:$0xff]  ;;  %1022 = vset.pattern.permute.xlu1 %v1142_v1  ;;  %1021 = vset.pattern.permute.xlu0 %v1143_v2  ;;  %v1183_v4 = vld [vmem:[%s1581_s0 + $0x8] sm:$0xff]  ;;  %v513_v8 = vld [vmem:[%s1583_s2 + $0x10] sm:$0xff] }
   0x2   :  { %248 = vperm.xlu1 %1022, %v18_v0   ;;  %53 = vperm.xlu0 %1021, %v18_v0   ;;  %v34_v3 = vld [vmem:[%s1581_s0 + $0x80] sm:$0xff]  ;;  %v35_v5 = vld [vmem:[%s1581_s0 + $0x88] sm:$0xff]  ;;  %v514_v10 = vld [vmem:[%s1583_s2 + $0x18] sm:$0xff] }
   0x3   :  { %v511_v6 = vld [vmem:[%s1583_s2] sm:$0xff]  ;;  %v512_v7 = vld [vmem:[%s1583_s2 + $0x8] sm:$0xff]  ;;  %v36_v11 = vld [vmem:[%s1581_s0 + $0x90] sm:$0xff]  ;;  %v972_v12 = vpack.c.bf16 %v514_v10, %v513_v8 }
   0x4   :  { %v968_v9 = vpack.c.bf16 %v512_v7, %v511_v6  ;;  %v515_v13 = vld [vmem:[%s1583_s2 + $0x20] sm:$0xff]  ;;  %v516_v14 = vld [vmem:[%s1583_s2 + $0x28] sm:$0xff] }
   0x5   :  { %v976_v15 = vpack.c.bf16 %v516_v14, %v515_v13 }
   0x6   :  { %312 = vperm.xlu1 %1022, %v34_v3   ;;  %133 = vperm.xlu0 %1021, %v34_v3  }
   0x7   :  { %1000 = vmatprep.subr.bf16.mxu1 %v968_v9  ;;  %969 = vmatprep.subr.bf16.mxu0 %v968_v9 }
   0x8   :  { %1008 = vmatpush3.bf16.msra.mxu1 %v968_v9  ;;  %971 = vmatpush3.bf16.msra.mxu0 %v968_v9 }
   0x9   :  { %1001 = vmatprep.subr.bf16.mxu1 %v972_v12 }
   0xa   :  { %1023 = vset.pattern.permute.xlu1 %v1143_v2  ;;  %58 = vperm.xlu0 %1021, %v1183_v4  }
   0xb   :  { %138 = vperm.xlu1 %1023, %v35_v5  }
   0xe   :  { %143 = vperm.xlu0 %1021, %v36_v11  }
   0xf   :  { %9 = vsyncpa [#allocation3], 0  ;;  %1024 = vset.pattern.permute.xlu1 %v1142_v1  ;;  %v1215_v16 = vld [vmem:[%s1581_s0 + $0x18] sm:$0xff]  ;;  %v517_v17 = vld [vmem:[%s1583_s2 + $0x30] sm:$0xff]  ;;  %973 = vmatprep.subr.bf16.mxu0 %v972_v12  ;;  %v211_v53 = vlaneseq }
  0x10   :  { %v518_v18 = vld [vmem:[%s1583_s2 + $0x38] sm:$0xff]  ;;  %316 = vperm.xlu1 %1024, %v35_v5   ;;  %1009 = vmatpush3.bf16.msra.mxu1 %v972_v12  ;;  %v20_v19 = vld [vmem:[%s1581_s0 + $0x10] sm:$0xff]  ;;  %v1230_v21 = vld [vmem:[%s1581_s0 + $0xa0] sm:$0xff] }
  0x11   :  { %975 = vmatpush3.bf16.msra.mxu0 %v972_v12  ;;  %1002 = vmatprep.subr.bf16.mxu1 %v976_v15  ;;  %v980_v20 = vpack.c.bf16 %v518_v18, %v517_v17  ;;  %v519_v22 = vld [vmem:[%s1583_s2 + $0x40] sm:$0xff]  ;;  %v520_v23 = vld [vmem:[%s1583_s2 + $0x48] sm:$0xff]  ;;  %v521_v26 = vld [vmem:[%s1583_s2 + $0x50] sm:$0xff]  ;;  %v212_v54 = vshrl.u32 %v211_v53, 7 }
  0x12   :  { %68 = vperm.xlu0 %1021, %v1215_v16   ;;  %977 = vmatprep.subr.bf16.mxu0 %v976_v15  ;;  %v1243_v24 = vld [vmem:[%s1581_s0 + $0x28] sm:$0xff]  ;;  %v984_v25 = vpack.c.bf16 %v520_v23, %v519_v22  ;;  %v522_v27 = vld [vmem:[%s1583_s2 + $0x58] sm:$0xff]  ;;  %v1256_v28 = vld [vmem:[%s1581_s0 + $0xb0] sm:$0xff] }
  0x13   :  { %v988_v29 = vpack.c.bf16 %v522_v27, %v521_v26  ;;  %v523_v30 = vld [vmem:[%s1583_s2 + $0x60] sm:$0xff]  ;;  %v524_v31 = vld [vmem:[%s1583_s2 + $0x68] sm:$0xff]  ;;  %v1268_v32 = vld [vmem:[%s1581_s0 + $0x38] sm:$0xff]  ;;  %v377_v55 = vsub.s32 1, %v212_v54  ;;  %v213_v56 = vsub.s32 0, %v212_v54  ;;  %v445_v60 = vsub.s32 2, %v212_v54 }
  0x14   :  { %1025 = vset.pattern.permute.xlu1 %v1143_v2  ;;  %1010 = vmatpush3.bf16.msra.mxu1 %v976_v15  ;;  %v992_v33 = vpack.c.bf16 %v524_v31, %v523_v30  ;;  %v525_v34 = vld [vmem:[%s1583_s2 + $0x70] sm:$0xff]  ;;  %v526_v35 = vld [vmem:[%s1583_s2 + $0x78] sm:$0xff]  ;;  %v42_v38 = vld [vmem:[%s1581_s0 + $0xc0] sm:$0xff] }
  0x15   :  { %63 = vperm.xlu1 %1025, %v20_v19   ;;  %1003 = vmatprep.subr.bf16.mxu1 %v980_v20  ;;  %v37_v36 = vld [vmem:[%s1581_s0 + $0x98] sm:$0xff]  ;;  %v996_v37 = vpack.c.bf16 %v526_v35, %v525_v34  ;;  %v27_v39 = vld [vmem:[%s1581_s0 + $0x48] sm:$0xff]  ;;  %v22_v40 = vld [vmem:[%s1581_s0 + $0x20] sm:$0xff] }
  0x16   :  { %153 = vperm.xlu0 %1021, %v1230_v21   ;;  %979 = vmatpush3.bf16.msra.mxu0 %v976_v15  ;;  %v1294_v41 = vld [vmem:[%s1581_s0 + $0xd0] sm:$0xff]  ;;  %v29_v42 = vld [vmem:[%s1581_s0 + $0x58] sm:$0xff]  ;;  %v1305_v43 = vld [vmem:[%s1581_s0 + $0xe0] sm:$0xff] }
  0x17   :  { %981 = vmatprep.subr.bf16.mxu0 %v980_v20  ;;  %v31_v44 = vld [vmem:[%s1581_s0 + $0x68] sm:$0xff]  ;;  %v1319_v46 = vld [vmem:[%s1581_s0 + $0xf0] sm:$0xff]  ;;  %v33_v47 = vld [vmem:[%s1581_s0 + $0x78] sm:$0xff] }
  0x18   :  { %1011 = vmatpush3.bf16.msra.mxu1 %v980_v20  ;;  %v39_v45 = vld [vmem:[%s1581_s0 + $0xa8] sm:$0xff]  ;;  %v24_v48 = vld [vmem:[%s1581_s0 + $0x30] sm:$0xff]  ;;  %v41_v49 = vld [vmem:[%s1581_s0 + $0xb8] sm:$0xff] }
  0x19   :  { %1026 = vset.pattern.permute.xlu1 %v1142_v1  ;;  %1004 = vmatprep.subr.bf16.mxu1 %v984_v25  ;;  %v26_v50 = vld [vmem:[%s1581_s0 + $0x40] sm:$0xff]  ;;  %v43_v51 = vld [vmem:[%s1581_s0 + $0xc8] sm:$0xff]  ;;  %v28_v52 = vld [vmem:[%s1581_s0 + $0x50] sm:$0xff] }
  0x1a   :  { %256 = vperm.xlu1 %1026, %v20_v19   ;;  %78 = vperm.xlu0 %1021, %v1243_v24   ;;  %v50_v57 = vld [vmem:[%s1582_s1] sm:$0x7]  ;;  %v45_v61 = vld [vmem:[%s1581_s0 + $0xd8] sm:$0xff] }
  0x1b   :  { %983 = vmatpush3.bf16.msra.mxu0 %v980_v20  ;;  %v1361_v58 = vrot.slane %v50_v57, %v377_v55  ;;  %v1363_v59 = vrot.slane %v50_v57, %v213_v56  ;;  %v30_v15 = vld [vmem:[%s1581_s0 + $0x60] sm:$0xff] }
  0x1c   :  { %985 = vmatprep.subr.bf16.mxu0 %v984_v25  ;;  %1012 = vmatpush3.bf16.msra.mxu1 %v984_v25 }
  0x1d   :  { %1005 = vmatprep.subr.bf16.mxu1 %v988_v29 }
  0x1e   :  { %320 = vperm.xlu1 %1026, %v36_v11   ;;  %163 = vperm.xlu0 %1021, %v1256_v28  }
  0x1f   :  { %987 = vmatpush3.bf16.msra.mxu0 %v984_v25 }
  0x20   :  { %989 = vmatprep.subr.bf16.mxu0 %v988_v29  ;;  %1013 = vmatpush3.bf16.msra.mxu1 %v988_v29 }
  0x21   :  { %1006 = vmatprep.subr.bf16.mxu1 %v992_v33 }
  0x22   :  { %1027 = vset.pattern.permute.xlu1 %v1143_v2  ;;  %88 = vperm.xlu0 %1021, %v1268_v32  }
  0x23   :  { %148 = vperm.xlu1 %1027, %v37_v36   ;;  %991 = vmatpush3.bf16.msra.mxu0 %v988_v29 }
  0x24   :  { %1014 = vmatpush3.bf16.msra.mxu1 %v992_v33  ;;  %993 = vmatprep.subr.bf16.mxu0 %v992_v33 }
  0x25   :  { %1007 = vmatprep.subr.bf16.mxu1 %v996_v37 }
  0x26   :  { %173 = vperm.xlu0 %1021, %v42_v38  }
  0x27   :  { %1028 = vset.pattern.permute.xlu1 %v1142_v1  ;;  %995 = vmatpush3.bf16.msra.mxu0 %v992_v33 }
  0x28   :  { %324 = vperm.xlu1 %1028, %v37_v36   ;;  %1015 = vmatpush3.bf16.msra.mxu1 %v996_v37 }
  0x29   :  { %997 = vmatprep.subr.bf16.mxu0 %v996_v37 }
  0x2a   :  { %98 = vperm.xlu0 %1021, %v27_v39  }
  0x2b   :  { %999 = vmatpush3.bf16.msra.mxu0 %v996_v37 }
  0x2c   :  { %1029 = vset.pattern.permute.xlu1 %v1143_v2 }
  0x2d   :  { %73 = vperm.xlu1 %1029, %v22_v40  }
  0x2e   :  { %183 = vperm.xlu0 %1021, %v1294_v41  }
  0x31   :  { %1030 = vset.pattern.permute.xlu1 %v1142_v1 }
  0x32   :  { %264 = vperm.xlu1 %1030, %v22_v40   ;;  %108 = vperm.xlu0 %1021, %v29_v42  }
  0x36   :  { %328 = vperm.xlu1 %1030, %v1230_v21   ;;  %193 = vperm.xlu0 %1021, %v1305_v43  }
  0x3a   :  { %1031 = vset.pattern.permute.xlu1 %v1143_v2  ;;  %118 = vperm.xlu0 %1021, %v31_v44  }
  0x3b   :  { %158 = vperm.xlu1 %1031, %v39_v45  }
  0x3e   :  { %203 = vperm.xlu0 %1021, %v1319_v46  }
  0x3f   :  { %1032 = vset.pattern.permute.xlu1 %v1142_v1 }
  0x40   :  { %332 = vperm.xlu1 %1032, %v39_v45  }
  0x42   :  { %128 = vperm.xlu0 %1021, %v33_v47  }
  0x44   :  { %1033 = vset.pattern.permute.xlu1 %v1143_v2 }
  0x45   :  { %83 = vperm.xlu1 %1033, %v24_v48  }
  0x46   :  { %1051 = vset.pattern.permute.xlu0 %v1142_v1 }
  0x47   :  { %252 = vperm.xlu0 %1051, %v1183_v4   ;;  %v1371_v4 = vrot.slane %v50_v57, %v445_v60 }
  0x49   :  { %1034 = vset.pattern.permute.xlu1 %v1142_v1 }
  0x4a   :  { %272 = vperm.xlu1 %1034, %v24_v48  }
  0x4b   :  { %260 = vperm.xlu0 %1051, %v1215_v16  }
  0x4e   :  { %336 = vperm.xlu1 %1034, %v1256_v28   ;;  %v47_v28 = vld [vmem:[%s1581_s0 + $0xe8] sm:$0xff] }
  0x4f   :  { %268 = vperm.xlu0 %1051, %v1243_v24  }
  0x52   :  { %1035 = vset.pattern.permute.xlu1 %v1143_v2 }
  0x53   :  { %168 = vperm.xlu1 %1035, %v41_v49   ;;  %276 = vperm.xlu0 %1051, %v1268_v32  }
  0x57   :  { %1036 = vset.pattern.permute.xlu1 %v1142_v1  ;;  %284 = vperm.xlu0 %1051, %v27_v39  }
  0x58   :  { %340 = vperm.xlu1 %1036, %v41_v49  }
  0x5b   :  { %292 = vperm.xlu0 %1051, %v29_v42  }
  0x5c   :  { %1037 = vset.pattern.permute.xlu1 %v1143_v2 }
  0x5d   :  { %93 = vperm.xlu1 %1037, %v26_v50  }
  0x5f   :  { %300 = vperm.xlu0 %1051, %v31_v44  }
  0x61   :  { %1038 = vset.pattern.permute.xlu1 %v1142_v1 }
  0x62   :  { %280 = vperm.xlu1 %1038, %v26_v50  }
  0x63   :  { %308 = vperm.xlu0 %1051, %v33_v47  }
  0x66   :  { %344 = vperm.xlu1 %1038, %v42_v38   ;;  %v32_v38 = vld [vmem:[%s1581_s0 + $0x70] sm:$0xff] }
  0x6a   :  { %1039 = vset.pattern.permute.xlu1 %v1143_v2 }
  0x6b   :  { %178 = vperm.xlu1 %1039, %v43_v51  }
  0x6f   :  { %1040 = vset.pattern.permute.xlu1 %v1142_v1 }
  0x70   :  { %348 = vperm.xlu1 %1040, %v43_v51  }
  0x74   :  { %1041 = vset.pattern.permute.xlu1 %v1143_v2 }
  0x75   :  { %103 = vperm.xlu1 %1041, %v28_v52  }
  0x79   :  { %1042 = vset.pattern.permute.xlu1 %v1142_v1 }
  0x7a   :  { %288 = vperm.xlu1 %1042, %v28_v52   ;;  %v49_v52 = vld [vmem:[%s1581_s0 + $0xf8] sm:$0xff] }
  0x7e   :  { %352 = vperm.xlu1 %1042, %v1294_v41  }
  0x81   :  { %v249_v62 = vpop.permute.xlu1 %248  ;;  %v54_v63 = vpop.permute.xlu0 %53 }
  0x82   :  { %v379_v0 = vmul.f32 %v1361_v58, %v249_v62  ;;  %v215_v3 = vmul.f32 %v1363_v59, %v54_v63  ;;  %1043 = vset.pattern.permute.xlu1 %v1143_v2 }
  0x83   :  { %188 = vperm.xlu1 %1043, %v45_v61  }
  0x84   :  { %v411_v5 = vadd.f32 %v379_v0, %v215_v3 }
  0x85   :  { %v313_v6 = vpop.permute.xlu1 %312  ;;  %v134_v7 = vpop.permute.xlu0 %133 }
  0x86   :  { %v395_v8 = vmul.f32 %v1361_v58, %v313_v6  ;;  %v231_v9 = vmul.f32 %v1363_v59, %v134_v7  ;;  %v447_v10 = vadd.f32 %v1371_v4, %v411_v5 }
  0x87   :  { %1044 = vset.pattern.permute.xlu1 %v1142_v1 }
  0x88   :  { %356 = vperm.xlu1 %1044, %v45_v61   ;;  %v479_v11 = vmax.f32 %v447_v10, 0.0  ;;  %v427_v12 = vadd.f32 %v395_v8, %v231_v9 }
  0x89   :  { %v1377_v13 = vpop.permute.xlu0 %58 }
  0x8a   :  { %v139_v14 = vpop.permute.xlu1 %138  ;;  %920 = vmatprep.mubr.f32.mxu0 %v479_v11  ;;  %v463_v16 = vadd.f32 %v1371_v4, %v427_v12  ;;  %v216_v12 = vmul.f32 %v1363_v59, %v1377_v13 }
  0x8b   :  { %v232_v20 = vmul.f32 %v1363_v59, %v139_v14 }
  0x8c   :  { %1045 = vset.pattern.permute.xlu1 %v1143_v2  ;;  %v495_v17 = vmax.f32 %v463_v16, 0.0 }
  0x8d   :  { %113 = vperm.xlu1 %1045, %v30_v15   ;;  %v144_v18 = vpop.permute.xlu0 %143 }
  0x8e   :  { %944 = vmatprep.mubr.f32.mxu1 %v495_v17  ;;  %v233_v31 = vmul.f32 %v1363_v59, %v144_v18 }
  0x8f   :  { %v317_v19 = vpop.permute.xlu1 %316 }
  0x90   :  { %v396_v21 = vmul.f32 %v1361_v58, %v317_v19 }
  0x91   :  { %1046 = vset.pattern.permute.xlu1 %v1142_v1  ;;  %v1387_v22 = vpop.permute.xlu0 %68 }
  0x92   :  { %v428_v23 = vadd.f32 %v396_v21, %v232_v20  ;;  %296 = vperm.xlu1 %1046, %v30_v15   ;;  %v218_v20 = vmul.f32 %v1363_v59, %v1387_v22 }
  0x94   :  { %v1389_v24 = vpop.permute.xlu1 %63  ;;  %v464_v25 = vadd.f32 %v1371_v4, %v428_v23 }
  0x95   :  { %v154_v26 = vpop.permute.xlu0 %153  ;;  %v217_v9 = vmul.f32 %v1363_v59, %v1389_v24 }
  0x96   :  { %360 = vperm.xlu1 %1046, %v1305_v43   ;;  %v496_v27 = vmax.f32 %v464_v25, 0.0  ;;  %v235_v55 = vmul.f32 %v1363_v59, %v154_v26 }
  0x98   :  { %945 = vmatmul.mubr.f32.vlgmr.msra.gmra.mrb[0].mxu1 %v496_v27 }
  0x99   :  { %v257_v29 = vpop.permute.xlu1 %256  ;;  %v1396_v30 = vpop.permute.xlu0 %78 }
  0x9a   :  { %1047 = vset.pattern.permute.xlu1 %v1143_v2  ;;  %v220_v22 = vmul.f32 %v1363_v59, %v1396_v30 }
  0x9b   :  { %198 = vperm.xlu1 %1047, %v47_v28  }
  0x9d   :  { %v321_v32 = vpop.permute.xlu1 %320  ;;  %v1400_v33 = vpop.permute.xlu0 %163 }
  0x9e   :  { %v397_v34 = vmul.f32 %v1361_v58, %v321_v32 }
  0x9f   :  { %1048 = vset.pattern.permute.xlu1 %v1142_v1 }
  0xa0   :  { %v429_v35 = vadd.f32 %v397_v34, %v233_v31  ;;  %364 = vperm.xlu1 %1048, %v47_v28  }
  0xa1   :  { %v1404_v36 = vpop.permute.xlu0 %88 }
  0xa2   :  { %v149_v37 = vpop.permute.xlu1 %148  ;;  %v465_v39 = vadd.f32 %v1371_v4, %v429_v35  ;;  %v222_v30 = vmul.f32 %v1363_v59, %v1404_v36 }
  0xa3   :  { %v234_v43 = vmul.f32 %v1363_v59, %v149_v37 }
  0xa4   :  { %1049 = vset.pattern.permute.xlu1 %v1143_v2  ;;  %v497_v40 = vmax.f32 %v465_v39, 0.0 }
  0xa5   :  { %123 = vperm.xlu1 %1049, %v32_v38   ;;  %v1411_v41 = vpop.permute.xlu0 %173 }
  0xa6   :  { %947 = vmatprep.mubr.f32.mxu1 %v497_v40 }
  0xa7   :  { %v325_v42 = vpop.permute.xlu1 %324 }
  0xa8   :  { %v398_v44 = vmul.f32 %v1361_v58, %v325_v42 }
  0xa9   :  { %1050 = vset.pattern.permute.xlu1 %v1142_v1  ;;  %v1416_v45 = vpop.permute.xlu0 %98 }
  0xaa   :  { %v430_v47 = vadd.f32 %v398_v44, %v234_v43  ;;  %304 = vperm.xlu1 %1050, %v32_v38  }
  0xac   :  { %v74_v48 = vpop.permute.xlu1 %73  ;;  %v466_v49 = vadd.f32 %v1371_v4, %v430_v47 }
  0xad   :  { %v1419_v50 = vpop.permute.xlu0 %183  ;;  %v219_v19 = vmul.f32 %v1363_v59, %v74_v48 }
  0xae   :  { %368 = vperm.xlu1 %1050, %v1319_v46   ;;  %v498_v51 = vmax.f32 %v466_v49, 0.0 }
  0xb0   :  { %948 = vmatmul.mubr.f32.gmra.mrb[2].mxu1 %v498_v51 }
  0xb1   :  { %v265_v53 = vpop.permute.xlu1 %264  ;;  %v1425_v54 = vpop.permute.xlu0 %108 }
  0xb2   :  { %1052 = vset.pattern.permute.xlu1 %v1143_v2  ;;  %v383_v15 = vmul.f32 %v1361_v58, %v265_v53 }
  0xb3   :  { %208 = vperm.xlu1 %1052, %v49_v52  }
  0xb4   :  { %v415_v24 = vadd.f32 %v383_v15, %v219_v19 }
  0xb5   :  { %v329_v56 = vpop.permute.xlu1 %328  ;;  %v1429_v57 = vpop.permute.xlu0 %193 }
  0xb6   :  { %v399_v60 = vmul.f32 %v1361_v58, %v329_v56  ;;  %v451_v42 = vadd.f32 %v1371_v4, %v415_v24  ;;  %v239_v24 = vmul.f32 %v1363_v59, %v1411_v41 }
  0xb7   :  { %1053 = vset.pattern.permute.xlu1 %v1142_v1  ;;  %v381_v1 = vmul.f32 %v1361_v58, %v257_v29  ;;  %v237_v29 = vmul.f32 %v1363_v59, %v1400_v33 }
  0xb8   :  { %v431_v46 = vadd.f32 %v399_v60, %v235_v55  ;;  %372 = vperm.xlu1 %1053, %v49_v52   ;;  %v483_v52 = vmax.f32 %v451_v42, 0.0  ;;  %v226_v42 = vmul.f32 %v1363_v59, %v1425_v54 }
  0xb9   :  { %v1433_v61 = vpop.permute.xlu0 %118  ;;  %v413_v14 = vadd.f32 %v381_v1, %v217_v9 }
  0xba   :  { %v159_v62 = vpop.permute.xlu1 %158  ;;  %v467_v63 = vadd.f32 %v1371_v4, %v431_v46 }
  0xbb   :  { %v236_v5 = vmul.f32 %v1363_v59, %v159_v62  ;;  %v449_v13 = vadd.f32 %v1371_v4, %v413_v14 }
  0xbc   :  { %v499_v0 = vmax.f32 %v467_v63, 0.0 }
  0xbd   :  { %v1436_v3 = vpop.permute.xlu0 %203  ;;  %v481_v40 = vmax.f32 %v449_v13, 0.0 }
  0xbe   :  { %950 = vmatprep.mubr.f32.mxu1 %v499_v0 }
  0xbf   :  { %v333_v2 = vpop.permute.xlu1 %332 }
  0xc0   :  { %v400_v6 = vmul.f32 %v1361_v58, %v333_v2 }
  0xc1   :  { %v1440_v7 = vpop.permute.xlu0 %128 }
  0xc2   :  { %v432_v8 = vadd.f32 %v400_v6, %v236_v5 }
  0xc4   :  { %v84_v10 = vpop.permute.xlu1 %83  ;;  %v468_v11 = vadd.f32 %v1371_v4, %v432_v8 }
  0xc5   :  { %v221_v31 = vmul.f32 %v1363_v59, %v84_v10 }
  0xc6   :  { %v253_v16 = vpop.permute.xlu0 %252  ;;  %v500_v17 = vmax.f32 %v468_v11, 0.0 }
  0xc7   :  { %v380_v18 = vmul.f32 %v1361_v58, %v253_v16 }
  0xc8   :  { %951 = vmatmul.mubr.f32.gmra.mrb[4].mxu1 %v500_v17 }
  0xc9   :  { %v412_v21 = vadd.f32 %v380_v18, %v216_v12  ;;  %v273_v23 = vpop.permute.xlu1 %272  ;;  %v224_v12 = vmul.f32 %v1363_v59, %v1416_v45 }
  0xca   :  { %v385_v25 = vmul.f32 %v1361_v58, %v273_v23  ;;  %v261_v26 = vpop.permute.xlu0 %260 }
  0xcb   :  { %v382_v27 = vmul.f32 %v1361_v58, %v261_v26  ;;  %v448_v28 = vadd.f32 %v1371_v4, %v412_v21 }
  0xcc   :  { %v417_v37 = vadd.f32 %v385_v25, %v221_v31 }
  0xcd   :  { %v414_v32 = vadd.f32 %v382_v27, %v218_v20  ;;  %v337_v34 = vpop.permute.xlu1 %336  ;;  %v480_v35 = vmax.f32 %v448_v28, 0.0 }
  0xce   :  { %v401_v38 = vmul.f32 %v1361_v58, %v337_v34  ;;  %v269_v39 = vpop.permute.xlu0 %268  ;;  %v453_v55 = vadd.f32 %v1371_v4, %v417_v37 }
  0xcf   :  { %v384_v43 = vmul.f32 %v1361_v58, %v269_v39  ;;  %921 = vmatmul.mubr.f32.vlgmr.msra.gmra.mrb[0].mxu0 %v480_v35  ;;  %v450_v33 = vadd.f32 %v1371_v4, %v414_v32 }
  0xd0   :  { %v433_v44 = vadd.f32 %v401_v38, %v237_v29  ;;  %923 = vmatprep.mubr.f32.mxu0 %v481_v40  ;;  %v485_v36 = vmax.f32 %v453_v55, 0.0 }
  0xd1   :  { %v416_v47 = vadd.f32 %v384_v43, %v220_v22  ;;  %v482_v48 = vmax.f32 %v450_v33, 0.0 }
  0xd2   :  { %v169_v49 = vpop.permute.xlu1 %168  ;;  %v277_v51 = vpop.permute.xlu0 %276  ;;  %v469_v53 = vadd.f32 %v1371_v4, %v433_v44 }
  0xd3   :  { %v386_v56 = vmul.f32 %v1361_v58, %v277_v51  ;;  %924 = vmatmul.mubr.f32.gmra.mrb[2].mxu0 %v482_v48  ;;  %v452_v60 = vadd.f32 %v1371_v4, %v416_v47  ;;  %v238_v5 = vmul.f32 %v1363_v59, %v169_v49  ;;  %v241_v51 = vmul.f32 %v1363_v59, %v1419_v50 }
  0xd4   :  { %926 = vmatprep.mubr.f32.mxu0 %v483_v52  ;;  %v501_v46 = vmax.f32 %v469_v53, 0.0 }
  0xd5   :  { %v418_v62 = vadd.f32 %v386_v56, %v222_v30  ;;  %v484_v63 = vmax.f32 %v452_v60, 0.0 }
  0xd6   :  { %953 = vmatprep.mubr.f32.mxu1 %v501_v46  ;;  %v285_v8 = vpop.permute.xlu0 %284 }
  0xd7   :  { %v341_v0 = vpop.permute.xlu1 %340  ;;  %927 = vmatmul.mubr.f32.gmra.mrb[4].mxu0 %v484_v63  ;;  %v454_v2 = vadd.f32 %v1371_v4, %v418_v62  ;;  %v388_v14 = vmul.f32 %v1361_v58, %v285_v8 }
  0xd8   :  { %v402_v6 = vmul.f32 %v1361_v58, %v341_v0  ;;  %929 = vmatprep.mubr.f32.mxu0 %v485_v36 }
  0xd9   :  { %v486_v1 = vmax.f32 %v454_v2, 0.0  ;;  %v420_v16 = vadd.f32 %v388_v14, %v224_v12 }
  0xda   :  { %v434_v9 = vadd.f32 %v402_v6, %v238_v5  ;;  %v293_v41 = vpop.permute.xlu0 %292 }
  0xdb   :  { %930 = vmatmul.mubr.f32.gmra.mrb[6].mxu0 %v486_v1  ;;  %v456_v23 = vadd.f32 %v1371_v4, %v420_v16  ;;  %v390_v39 = vmul.f32 %v1361_v58, %v293_v41 }
  0xdc   :  { %v94_v10 = vpop.permute.xlu1 %93  ;;  %v470_v11 = vadd.f32 %v1371_v4, %v434_v9  ;;  %v228_v9 = vmul.f32 %v1363_v59, %v1433_v61 }
  0xdd   :  { %v223_v18 = vmul.f32 %v1363_v59, %v94_v10  ;;  %v488_v27 = vmax.f32 %v456_v23, 0.0  ;;  %v422_v43 = vadd.f32 %v390_v39, %v226_v42 }
  0xde   :  { %v502_v15 = vmax.f32 %v470_v11, 0.0  ;;  %v301_v50 = vpop.permute.xlu0 %300 }
  0xdf   :  { %v458_v49 = vadd.f32 %v1371_v4, %v422_v43  ;;  %v392_v1 = vmul.f32 %v1361_v58, %v301_v50  ;;  %v245_v43 = vmul.f32 %v1363_v59, %v1436_v3 }
  0xe0   :  { %954 = vmatmul.mubr.f32.gmra.mrb[6].mxu1 %v502_v15 }
  0xe1   :  { %v281_v17 = vpop.permute.xlu1 %280  ;;  %v490_v56 = vmax.f32 %v458_v49, 0.0  ;;  %v424_v10 = vadd.f32 %v392_v1, %v228_v9 }
  0xe2   :  { %v387_v19 = vmul.f32 %v1361_v58, %v281_v17 }
  0xe3   :  { %v460_v17 = vadd.f32 %v1371_v4, %v424_v10 }
  0xe4   :  { %v419_v20 = vadd.f32 %v387_v19, %v223_v18  ;;  %v243_v18 = vmul.f32 %v1363_v59, %v1429_v57  ;;  %v309_v57 = vpop.permute.xlu0 %308 }
  0xe5   :  { %v345_v21 = vpop.permute.xlu1 %344  ;;  %v492_v23 = vmax.f32 %v460_v17, 0.0 }
  0xe6   :  { %v403_v25 = vmul.f32 %v1361_v58, %v345_v21  ;;  %v455_v45 = vadd.f32 %v1371_v4, %v419_v20 }
  0xe8   :  { %v435_v26 = vadd.f32 %v403_v25, %v239_v24  ;;  %v487_v13 = vmax.f32 %v455_v45, 0.0 }
  0xea   :  { %v179_v28 = vpop.permute.xlu1 %178  ;;  %932 = vmatprep.mubr.f32.mxu0 %v487_v13  ;;  %v471_v29 = vadd.f32 %v1371_v4, %v435_v26 }
  0xeb   :  { %933 = vmatmul.mubr.f32.gmra.mrb[8].mxu0 %v488_v27  ;;  %v240_v32 = vmul.f32 %v1363_v59, %v179_v28 }
  0xec   :  { %v503_v31 = vmax.f32 %v471_v29, 0.0 }
  0xee   :  { %956 = vmatprep.mubr.f32.mxu1 %v503_v31 }
  0xef   :  { %v349_v22 = vpop.permute.xlu1 %348 }
  0xf0   :  { %v404_v34 = vmul.f32 %v1361_v58, %v349_v22  ;;  %v394_v22 = vmul.f32 %v1361_v58, %v309_v57 }
  0xf2   :  { %v436_v35 = vadd.f32 %v404_v34, %v240_v32  ;;  %v230_v34 = vmul.f32 %v1363_v59, %v1440_v7 }
  0xf4   :  { %v104_v37 = vpop.permute.xlu1 %103  ;;  %v472_v38 = vadd.f32 %v1371_v4, %v436_v35  ;;  %v426_v41 = vadd.f32 %v394_v22, %v230_v34 }
  0xf5   :  { %v225_v44 = vmul.f32 %v1363_v59, %v104_v37 }
  0xf6   :  { %v504_v40 = vmax.f32 %v472_v38, 0.0  ;;  %v462_v42 = vadd.f32 %v1371_v4, %v426_v41 }
  0xf8   :  { %957 = vmatmul.mubr.f32.gmra.mrb[8].mxu1 %v504_v40 }
  0xf9   :  { %v289_v33 = vpop.permute.xlu1 %288 }
  0xfa   :  { %v389_v30 = vmul.f32 %v1361_v58, %v289_v33 }
  0xfc   :  { %v421_v47 = vadd.f32 %v389_v30, %v225_v44 }
  0xfd   :  { %v353_v48 = vpop.permute.xlu1 %352 }
  0xfe   :  { %v405_v52 = vmul.f32 %v1361_v58, %v353_v48  ;;  %v457_v53 = vadd.f32 %v1371_v4, %v421_v47  ;;  %v494_v47 = vmax.f32 %v462_v42, 0.0 }
 0x100   :  { %v437_v55 = vadd.f32 %v405_v52, %v241_v51  ;;  %v489_v54 = vmax.f32 %v457_v53, 0.0 }
 0x102   :  { %v189_v60 = vpop.permute.xlu1 %188  ;;  %935 = vmatprep.mubr.f32.mxu0 %v489_v54  ;;  %v473_v46 = vadd.f32 %v1371_v4, %v437_v55 }
 0x103   :  { %936 = vmatmul.mubr.f32.gmra.mrb[10].mxu0 %v490_v56  ;;  %v242_v36 = vmul.f32 %v1363_v59, %v189_v60  ;;  %v1535_v60 = vld [vmem:[%s1584_s3] ss:$0 sm:$0xff]  ;;  %s1144_s3 = smov [#allocation2]  }
 0x104   :  { %v505_v62 = vmax.f32 %v473_v46, 0.0  ;;  %s828_s7 = sshll.u32 %s1144_s3, 4  ;;  %s829_s7 = int_to_ptr.vmem [resolvable:$true] %s828_s7 }
 0x105   :  { %s1118_s8 = scalar_lea.vmem %s829_s7, 4096  ;;  %p1123_p1 = scmp.lt.s32.totalorder %s829_s7, %s829_s7 }
 0x106   :  { %959 = vmatprep.mubr.f32.mxu1 %v505_v62  ;;  %p1119_p0 = scmp.ne.s32.totalorder %s829_s7, %s1118_s8  ;;  %p1124_p2 = scmp.lt.s32.totalorder %s1118_s8, %s1118_s8 }
 0x107   :  { %v357_v63 = vpop.permute.xlu1 %356 }
 0x108   :  { %v406_v0 = vmul.f32 %v1361_v58, %v357_v63  ;;  %p1125_p3 = por %p1124_p2, %p1123_p1 }
 0x10a   :  { %v438_v2 = vadd.f32 %v406_v0, %v242_v36  ;;  %p1126_p4 = pnand %p1125_p3, %p1119_p0 }
 0x10c   :  { %v114_v5 = vpop.permute.xlu1 %113  ;;  %v474_v6 = vadd.f32 %v1371_v4, %v438_v2 }
 0x10d   :  { %v227_v12 = vmul.f32 %v1363_v59, %v114_v5 }
 0x10e   :  { %v506_v8 = vmax.f32 %v474_v6, 0.0 }
 0x110   :  { %960 = vmatmul.mubr.f32.gmra.mrb[10].mxu1 %v506_v8 }
 0x111   :  { %v297_v11 = vpop.permute.xlu1 %296 }
 0x112   :  { %v391_v14 = vmul.f32 %v1361_v58, %v297_v11 }
 0x114   :  { %v423_v15 = vadd.f32 %v391_v14, %v227_v12 }
 0x115   :  { %v361_v16 = vpop.permute.xlu1 %360 }
 0x116   :  { %v407_v19 = vmul.f32 %v1361_v58, %v361_v16  ;;  %v459_v20 = vadd.f32 %v1371_v4, %v423_v15 }
 0x118   :  { %v439_v21 = vadd.f32 %v407_v19, %v243_v18  ;;  %v491_v61 = vmax.f32 %v459_v20, 0.0 }
 0x11a   :  { %v199_v24 = vpop.permute.xlu1 %198  ;;  %938 = vmatprep.mubr.f32.mxu0 %v491_v61  ;;  %v475_v25 = vadd.f32 %v1371_v4, %v439_v21 }
 0x11b   :  { %939 = vmatmul.mubr.f32.gmra.mrb[12].mxu0 %v492_v23  ;;  %v244_v13 = vmul.f32 %v1363_v59, %v199_v24 }
 0x11c   :  { %v507_v45 = vmax.f32 %v475_v25, 0.0 }
 0x11e   :  { %962 = vmatprep.mubr.f32.mxu1 %v507_v45 }
 0x11f   :  { %v365_v26 = vpop.permute.xlu1 %364 }
 0x120   :  { %v408_v27 = vmul.f32 %v1361_v58, %v365_v26 }
 0x122   :  { %v440_v28 = vadd.f32 %v408_v27, %v244_v13 }
 0x124   :  { %v124_v29 = vpop.permute.xlu1 %123  ;;  %v476_v31 = vadd.f32 %v1371_v4, %v440_v28 }
 0x125   :  { %v229_v37 = vmul.f32 %v1363_v59, %v124_v29 }
 0x126   :  { %v508_v32 = vmax.f32 %v476_v31, 0.0 }
 0x128   :  { %963 = vmatmul.mubr.f32.gmra.mrb[12].mxu1 %v508_v32 }
 0x129   :  { %v305_v35 = vpop.permute.xlu1 %304 }
 0x12a   :  { %v393_v38 = vmul.f32 %v1361_v58, %v305_v35 }
 0x12c   :  { %v425_v39 = vadd.f32 %v393_v38, %v229_v37 }
 0x12d   :  { %v369_v40 = vpop.permute.xlu1 %368 }
 0x12e   :  { %v409_v33 = vmul.f32 %v1361_v58, %v369_v40  ;;  %v461_v44 = vadd.f32 %v1371_v4, %v425_v39 }
 0x130   :  { %v441_v30 = vadd.f32 %v409_v33, %v245_v43  ;;  %v493_v7 = vmax.f32 %v461_v44, 0.0 }
 0x132   :  { %v209_v48 = vpop.permute.xlu1 %208  ;;  %941 = vmatprep.mubr.f32.mxu0 %v493_v7  ;;  %v477_v49 = vadd.f32 %v1371_v4, %v441_v30 }
 0x133   :  { %942 = vmatmul.mubr.f32.gmra.mrb[14].mxu0 %v494_v47  ;;  %v246_v53 = vmul.f32 %v1363_v59, %v209_v48 }
 0x134   :  { %v509_v51 = vmax.f32 %v477_v49, 0.0 }
 0x136   :  { %965 = vmatprep.mubr.f32.mxu1 %v509_v51 }
 0x137   :  { %v373_v52 = vpop.permute.xlu1 %372 }
 0x138   :  { %v410_v55 = vmul.f32 %v1361_v58, %v373_v52 }
 0x13a   :  { %v442_v3 = vadd.f32 %v410_v55, %v246_v53 }
 0x13c   :  { %v478_v54 = vadd.f32 %v1371_v4, %v442_v3 }
 0x13e   :  { %v510_v56 = vmax.f32 %v478_v54, 0.0 }
 0x140   :  { %966 = vmatmul.mubr.f32.gmra.mrb[14].mxu1 %v510_v56 }
 0x16b   :  { %v946_v46 = vpop.f32.mrb[0].mxu1 }
 0x16c   :  { %v686_v62 = vadd.f32 %v946_v46, %v1535_v60  ;;  %v680_v63 = vpop.f32.mrb[1].mxu1 }
 0x16d   :  { %v681_v36 = vadd.f32 %v1535_v60, %v680_v63 }
 0x16e   :  { %1054 = vtanh.f32 %v686_v62 }
 0x16f   :  { %1056 = vtanh.f32 %v681_v36 }
 0x178   :  { %v1055_v59 = vpop.eup %1054 }
 0x179   :  { %v1057_v58 = vpop.eup %1056  ;;  %808 = vst [vmem:[#allocation2 + $0x88] sm:$0xff] %v1055_v59 }
 0x17a   :  { %807 = vst [vmem:[#allocation2 + $0x80] sm:$0xff] %v1057_v58 }
 0x183   :  { %v949_v4 = vpop.f32.mrb[2].mxu1 }
 0x184   :  { %v696_v0 = vadd.f32 %v949_v4, %v1535_v60  ;;  %v690_v50 = vpop.f32.mrb[3].mxu1 }
 0x185   :  { %v691_v2 = vadd.f32 %v1535_v60, %v690_v50 }
 0x186   :  { %1058 = vtanh.f32 %v696_v0 }
 0x187   :  { %1060 = vtanh.f32 %v691_v2 }
 0x190   :  { %v1059_v5 = vpop.eup %1058 }
 0x191   :  { %v1061_v6 = vpop.eup %1060  ;;  %810 = vst [vmem:[#allocation2 + $0x98] sm:$0xff] %v1059_v5 }
 0x192   :  { %809 = vst [vmem:[#allocation2 + $0x90] sm:$0xff] %v1061_v6 }
 0x19b   :  { %v952_v1 = vpop.f32.mrb[4].mxu1 }
 0x19c   :  { %v706_v8 = vadd.f32 %v952_v1, %v1535_v60  ;;  %v700_v9 = vpop.f32.mrb[5].mxu1 }
 0x19d   :  { %v701_v10 = vadd.f32 %v1535_v60, %v700_v9 }
 0x19e   :  { %1062 = vtanh.f32 %v706_v8 }
 0x19f   :  { %1064 = vtanh.f32 %v701_v10 }
 0x1a2   :  { %v922_v11 = vpop.f32.mrb[0].mxu0 }
 0x1a3   :  { %v606_v12 = vadd.f32 %v922_v11, %v1535_v60  ;;  %v600_v14 = vpop.f32.mrb[1].mxu0 }
 0x1a4   :  { %v601_v15 = vadd.f32 %v1535_v60, %v600_v14 }
 0x1a5   :  { %1066 = vtanh.f32 %v606_v12 }
 0x1a6   :  { %1068 = vtanh.f32 %v601_v15  ;;  %v925_v16 = vpop.f32.mrb[2].mxu0 }
 0x1a7   :  { %v616_v17 = vadd.f32 %v925_v16, %v1535_v60  ;;  %v610_v18 = vpop.f32.mrb[3].mxu0 }
 0x1a8   :  { %v1063_v19 = vpop.eup %1062  ;;  %v611_v20 = vadd.f32 %v1535_v60, %v610_v18 }
 0x1a9   :  { %v1065_v21 = vpop.eup %1064  ;;  %812 = vst [vmem:[#allocation2 + $0xa8] sm:$0xff] %v1063_v19  ;;  %1070 = vtanh.f32 %v616_v17 }
 0x1aa   :  { %811 = vst [vmem:[#allocation2 + $0xa0] sm:$0xff] %v1065_v21  ;;  %1072 = vtanh.f32 %v611_v20  ;;  %v928_v61 = vpop.f32.mrb[4].mxu0 }
 0x1ab   :  { %v626_v23 = vadd.f32 %v928_v61, %v1535_v60  ;;  %v620_v24 = vpop.f32.mrb[5].mxu0 }
 0x1ac   :  { %v621_v25 = vadd.f32 %v1535_v60, %v620_v24 }
 0x1ad   :  { %1074 = vtanh.f32 %v626_v23 }
 0x1ae   :  { %1076 = vtanh.f32 %v621_v25  ;;  %v931_v45 = vpop.f32.mrb[6].mxu0 }
 0x1af   :  { %v1067_v26 = vpop.eup %1066  ;;  %v636_v13 = vadd.f32 %v931_v45, %v1535_v60  ;;  %v630_v27 = vpop.f32.mrb[7].mxu0 }
 0x1b0   :  { %v1069_v57 = vpop.eup %1068  ;;  %792 = vst [vmem:[#allocation2 + $0x8] sm:$0xff] %v1067_v26  ;;  %v631_v28 = vadd.f32 %v1535_v60, %v630_v27 }
 0x1b1   :  { %791 = vst [vmem:[#allocation2] sm:$0xff] %v1069_v57  ;;  %1078 = vtanh.f32 %v636_v13 }
 0x1b2   :  { %1080 = vtanh.f32 %v631_v28 }
 0x1b3   :  { %v1071_v29 = vpop.eup %1070  ;;  %v955_v31 = vpop.f32.mrb[6].mxu1 }
 0x1b4   :  { %v1073_v22 = vpop.eup %1072  ;;  %794 = vst [vmem:[#allocation2 + $0x18] sm:$0xff] %v1071_v29  ;;  %v716_v32 = vadd.f32 %v955_v31, %v1535_v60  ;;  %v710_v34 = vpop.f32.mrb[7].mxu1 }
 0x1b5   :  { %793 = vst [vmem:[#allocation2 + $0x10] sm:$0xff] %v1073_v22  ;;  %v711_v41 = vadd.f32 %v1535_v60, %v710_v34 }
 0x1b6   :  { %1082 = vtanh.f32 %v716_v32 }
 0x1b7   :  { %v1075_v35 = vpop.eup %1074  ;;  %1084 = vtanh.f32 %v711_v41 }
 0x1b8   :  { %v1077_v37 = vpop.eup %1076  ;;  %796 = vst [vmem:[#allocation2 + $0x28] sm:$0xff] %v1075_v35 }
 0x1b9   :  { %795 = vst [vmem:[#allocation2 + $0x20] sm:$0xff] %v1077_v37 }
 0x1bb   :  { %v1079_v38 = vpop.eup %1078 }
 0x1bc   :  { %v1081_v39 = vpop.eup %1080  ;;  %798 = vst [vmem:[#allocation2 + $0x38] sm:$0xff] %v1079_v38 }
 0x1bd   :  { %797 = vst [vmem:[#allocation2 + $0x30] sm:$0xff] %v1081_v39 }
 0x1be   :  { %v934_v40 = vpop.f32.mrb[8].mxu0 }
 0x1bf   :  { %v646_v42 = vadd.f32 %v934_v40, %v1535_v60  ;;  %v640_v43 = vpop.f32.mrb[9].mxu0 }
 0x1c0   :  { %v1083_v33 = vpop.eup %1082  ;;  %v641_v44 = vadd.f32 %v1535_v60, %v640_v43 }
 0x1c1   :  { %v1085_v30 = vpop.eup %1084  ;;  %814 = vst [vmem:[#allocation2 + $0xb8] sm:$0xff] %v1083_v33  ;;  %1086 = vtanh.f32 %v646_v42 }
 0x1c2   :  { %813 = vst [vmem:[#allocation2 + $0xb0] sm:$0xff] %v1085_v30  ;;  %1088 = vtanh.f32 %v641_v44 }
 0x1cb   :  { %v1087_v7 = vpop.eup %1086  ;;  %v958_v47 = vpop.f32.mrb[8].mxu1 }
 0x1cc   :  { %v1089_v48 = vpop.eup %1088  ;;  %800 = vst [vmem:[#allocation2 + $0x48] sm:$0xff] %v1087_v7  ;;  %v726_v49 = vadd.f32 %v958_v47, %v1535_v60  ;;  %v720_v51 = vpop.f32.mrb[9].mxu1 }
 0x1cd   :  { %799 = vst [vmem:[#allocation2 + $0x40] sm:$0xff] %v1089_v48  ;;  %v721_v52 = vadd.f32 %v1535_v60, %v720_v51 }
 0x1ce   :  { %1090 = vtanh.f32 %v726_v49 }
 0x1cf   :  { %1092 = vtanh.f32 %v721_v52 }
 0x1d6   :  { %v937_v53 = vpop.f32.mrb[10].mxu0 }
 0x1d7   :  { %v656_v55 = vadd.f32 %v937_v53, %v1535_v60  ;;  %v650_v3 = vpop.f32.mrb[11].mxu0 }
 0x1d8   :  { %v1091_v54 = vpop.eup %1090  ;;  %v651_v56 = vadd.f32 %v1535_v60, %v650_v3 }
 0x1d9   :  { %v1093_v46 = vpop.eup %1092  ;;  %816 = vst [vmem:[#allocation2 + $0xc8] sm:$0xff] %v1091_v54  ;;  %1094 = vtanh.f32 %v656_v55 }
 0x1da   :  { %815 = vst [vmem:[#allocation2 + $0xc0] sm:$0xff] %v1093_v46  ;;  %1096 = vtanh.f32 %v651_v56 }
 0x1e3   :  { %v1095_v62 = vpop.eup %1094  ;;  %v961_v63 = vpop.f32.mrb[10].mxu1 }
 0x1e4   :  { %v1097_v36 = vpop.eup %1096  ;;  %802 = vst [vmem:[#allocation2 + $0x58] sm:$0xff] %v1095_v62  ;;  %v736_v59 = vadd.f32 %v961_v63, %v1535_v60  ;;  %v730_v58 = vpop.f32.mrb[11].mxu1 }
 0x1e5   :  { %801 = vst [vmem:[#allocation2 + $0x50] sm:$0xff] %v1097_v36  ;;  %v731_v4 = vadd.f32 %v1535_v60, %v730_v58 }
 0x1e6   :  { %1098 = vtanh.f32 %v736_v59 }
 0x1e7   :  { %1100 = vtanh.f32 %v731_v4 }
 0x1ee   :  { %v940_v0 = vpop.f32.mrb[12].mxu0 }
 0x1ef   :  { %v666_v50 = vadd.f32 %v940_v0, %v1535_v60  ;;  %v660_v2 = vpop.f32.mrb[13].mxu0 }
 0x1f0   :  { %v1099_v5 = vpop.eup %1098  ;;  %v661_v6 = vadd.f32 %v1535_v60, %v660_v2 }
 0x1f1   :  { %v1101_v1 = vpop.eup %1100  ;;  %818 = vst [vmem:[#allocation2 + $0xd8] sm:$0xff] %v1099_v5  ;;  %1102 = vtanh.f32 %v666_v50 }
 0x1f2   :  { %817 = vst [vmem:[#allocation2 + $0xd0] sm:$0xff] %v1101_v1  ;;  %1104 = vtanh.f32 %v661_v6 }
 0x1fb   :  { %v1103_v8 = vpop.eup %1102  ;;  %v964_v9 = vpop.f32.mrb[12].mxu1 }
 0x1fc   :  { %v1105_v10 = vpop.eup %1104  ;;  %804 = vst [vmem:[#allocation2 + $0x68] sm:$0xff] %v1103_v8  ;;  %v746_v11 = vadd.f32 %v964_v9, %v1535_v60  ;;  %v740_v12 = vpop.f32.mrb[13].mxu1 }
 0x1fd   :  { %803 = vst [vmem:[#allocation2 + $0x60] sm:$0xff] %v1105_v10  ;;  %v741_v14 = vadd.f32 %v1535_v60, %v740_v12 }
 0x1fe   :  { %1106 = vtanh.f32 %v746_v11 }
 0x1ff   :  { %1108 = vtanh.f32 %v741_v14 }
 0x206   :  { %v943_v15 = vpop.f32.mrb[14].mxu0 }
 0x207   :  { %v676_v16 = vadd.f32 %v943_v15, %v1535_v60  ;;  %v670_v17 = vpop.f32.mrb[15].mxu0 }
 0x208   :  { %v1107_v18 = vpop.eup %1106  ;;  %v671_v19 = vadd.f32 %v1535_v60, %v670_v17 }
 0x209   :  { %v1109_v20 = vpop.eup %1108  ;;  %820 = vst [vmem:[#allocation2 + $0xe8] sm:$0xff] %v1107_v18  ;;  %1110 = vtanh.f32 %v676_v16 }
 0x20a   :  { %819 = vst [vmem:[#allocation2 + $0xe0] sm:$0xff] %v1109_v20  ;;  %1112 = vtanh.f32 %v671_v19 }
 0x213   :  { %v1111_v21 = vpop.eup %1110  ;;  %v967_v61 = vpop.f32.mrb[14].mxu1 }
 0x214   :  { %v1113_v23 = vpop.eup %1112  ;;  %806 = vst [vmem:[#allocation2 + $0x78] sm:$0xff] %v1111_v21  ;;  %v756_v24 = vadd.f32 %v967_v61, %v1535_v60  ;;  %v750_v25 = vpop.f32.mrb[15].mxu1 }
 0x215   :  { %805 = vst [vmem:[#allocation2 + $0x70] sm:$0xff] %v1113_v23  ;;  %v751_v45 = vadd.f32 %v1535_v60, %v750_v25 }
 0x216   :  { %1114 = vtanh.f32 %v756_v24 }
 0x217   :  { %1116 = vtanh.f32 %v751_v45 }
 0x220   :  { %v1115_v26 = vpop.eup %1114 }
 0x221   :  { %v1117_v13 = vpop.eup %1116  ;;  %822 = vst [vmem:[#allocation2 + $0xf8] sm:$0xff] %v1115_v26 }
 0x222   :  { %821 = vst [vmem:[#allocation2 + $0xf0] sm:$0xff] %v1117_v13 }
 0x223   :  { %1129 = shalt.err (!%p1126_p4)
}
 0x224   :  { %s1130_s11 = scalar_lea.hbm %s1585_s4, 4096 }
 0x225   :  { %p1131_p5 = scmp.ne.s32.totalorder %s1585_s4, %s1130_s11  ;;  %p1134_p6 = scmp.lt.u32.totalorder %s1130_s11, %s1585_s4 }
 0x227   :  { %p1136_p7 = pnand %p1134_p6, %p1131_p5 }
 0x229   :  { %1139 = shalt.err (!%p1136_p7)
}
 0x22a   :  { %s1145_s16 = smov 128   ;;  %s1146_s17 = smov 8  }
 0x22b   :  { %834 = dma.vmem_to_hbm [thread:$0]  %s829_s7, 4096, %s1585_s4, [#allocation3], %s1145_s16, %s1145_s16, %s1146_s17  }
 0x22c   :  { %1140 = dma.done.wait [#allocation3], 4096  }
 0x22d   :  { %1141 = vsyncadd [#allocation3], 4294963200 }
 0x22e   :  { %838 = vsyncpa [#allocation3], 1 }

</bundles_post_ra>
